<compile_context>
chip_gen: v7x
topology: tpu7x:2x2x1
jax: 0.10.0
libtpu: 0.0.40
codegen_flags: <defaults>
</compile_context>

<pallas_src>
import jax
import jax.numpy as jnp
from jax.experimental import pallas as pl
from jax.experimental.pallas import tpu as pltpu

# ----------------------------- small config ---------------------------------
B = 2       # batch
S = 8       # seq_len
D = 32      # d_model
V = 128     # vocab_size (lane-dense: multiple of 128)
EPS = 1e-5  # RMSNorm eps


# ------------------------------- kernel --------------------------------------
def projection_kernel(x_ref, g_ref, w_ref, b_ref, o_ref):
    """Fused RMSNorm -> Linear -> log_softmax for the whole (B*S, D) slab."""
    x = x_ref[...]                                              # (N, D) f32
    # RMSNorm with learned scale.
    ms = jnp.mean(x * x, axis=-1, keepdims=True)                # (N, 1)
    xn = x * jax.lax.rsqrt(ms + EPS) * g_ref[...]               # (N, D)
    # Projection to vocab (single MXU matmul, f32 accumulation) + bias.
    logits = jnp.dot(xn, w_ref[...],
                     preferred_element_type=jnp.float32) + b_ref[...]  # (N, V)
    # Numerically-stable log_softmax over the vocab (lane) axis.
    m = jnp.max(logits, axis=-1, keepdims=True)
    z = logits - m
    lse = jnp.log(jnp.sum(jnp.exp(z), axis=-1, keepdims=True))
    o_ref[...] = z - lse                                        # (N, V)


# ------------------------------- wrapper --------------------------------------
@jax.jit
def projection_forward(x, g, w, b):
    b_, s_, d_ = x.shape
    v_ = w.shape[1]
    x2 = x.reshape(b_ * s_, d_)              # contiguous, effectively free
    vmem = pl.BlockSpec(memory_space=pltpu.MemorySpace.VMEM)
    out = pl.pallas_call(
        projection_kernel,
        out_shape=jax.ShapeDtypeStruct((b_ * s_, v_), jnp.float32),
        in_specs=[vmem, vmem, vmem, vmem],
        out_specs=vmem,
    )(x2, g, w, b)
    return out.reshape(b_, s_, v_)


# ----------------------------- pure-JAX reference -----------------------------
def projection_ref(x, g, w, b):
    ms = jnp.mean(x * x, axis=-1, keepdims=True)
    xn = x * jax.lax.rsqrt(ms + EPS) * g[0]
    logits = xn @ w + b[0]
    return jax.nn.log_softmax(logits, axis=-1)


# --------------------------------- main ---------------------------------------
if __name__ == "__main__":
    key = jax.random.PRNGKey(0)
    ks = jax.random.split(key, 4)

    def lin(k, fan_in, shape):
        bound = 1.0 / jnp.sqrt(jnp.float32(fan_in))
        return jax.random.uniform(k, shape, jnp.float32, -bound, bound)

    g = jnp.ones((1, D), jnp.float32)                 # RMSNorm scale
    w = lin(ks[0], D, (D, V))                         # (in, out) layout: x @ W
    bias = lin(ks[1], D, (1, V))                      # nn.Linear bias
    x = jax.random.normal(ks[2], (B, S, D), jnp.float32)

    out = projection_forward(x, g, w, bias)
    out = jax.block_until_ready(out)

    ref = projection_ref(x, g, w, bias)
    assert out.shape == (B, S, V), out.shape
    assert bool(jnp.all(jnp.isfinite(out)))
    assert bool(jnp.allclose(out, ref, atol=2e-2, rtol=2e-2)), \
        float(jnp.max(jnp.abs(out - ref)))
    # log_softmax sanity: rows must (log-)sum to ~0.
    row_lse = jax.nn.logsumexp(out, axis=-1)
    assert bool(jnp.allclose(row_lse, jnp.zeros_like(row_lse), atol=1e-3))
    print("KERNEL_OK")
</pallas_src>

<mosaic_0001>
module attributes {stable_mosaic.version = 11 : i64} {
  func.func @projection_kernel(%arg0: memref<16x32xf32, #tpu.memory_space<vmem>>, %arg1: memref<1x32xf32, #tpu.memory_space<vmem>>, %arg2: memref<32x128xf32, #tpu.memory_space<vmem>>, %arg3: memref<1x128xf32, #tpu.memory_space<vmem>>, %arg4: memref<16x128xf32, #tpu.memory_space<vmem>>) attributes {dimension_semantics = [], scalar_prefetch = 0 : i64, scratch_operands = 0 : i64, tpu.core_type = #tpu.core_type<tc>} {
    %c0 = arith.constant 0 : index
    %c0_0 = arith.constant 0 : index
    %0 = vector.load %arg0[%c0, %c0_0] : memref<16x32xf32, #tpu.memory_space<vmem>>, vector<16x32xf32>
    %1 = arith.mulf %0, %0 : vector<16x32xf32>
    %cst = arith.constant dense<0.000000e+00> : vector<16xf32>
    %2 = vector.multi_reduction <add>, %1, %cst [1] : vector<16x32xf32> to vector<16xf32>
    %3 = vector.shape_cast %2 : vector<16xf32> to vector<16x1xf32>
    %cst_1 = arith.constant 3.200000e+01 : f32
    %4 = vector.broadcast %cst_1 : f32 to vector<16x1xf32>
    %5 = arith.divf %3, %4 : vector<16x1xf32>
    %cst_2 = arith.constant 9.99999974E-6 : f32
    %6 = vector.broadcast %cst_2 : f32 to vector<16x1xf32>
    %7 = arith.addf %5, %6 : vector<16x1xf32>
    %8 = math.rsqrt %7 : vector<16x1xf32>
    %9 = vector.broadcast %8 : vector<16x1xf32> to vector<16x32xf32>
    %10 = arith.mulf %0, %9 : vector<16x32xf32>
    %c0_3 = arith.constant 0 : index
    %c0_4 = arith.constant 0 : index
    %11 = vector.load %arg1[%c0_3, %c0_4] : memref<1x32xf32, #tpu.memory_space<vmem>>, vector<1x32xf32>
    %12 = vector.broadcast %11 : vector<1x32xf32> to vector<16x32xf32>
    %13 = arith.mulf %10, %12 : vector<16x32xf32>
    %c0_5 = arith.constant 0 : index
    %c0_6 = arith.constant 0 : index
    %14 = vector.load %arg2[%c0_5, %c0_6] : memref<32x128xf32, #tpu.memory_space<vmem>>, vector<32x128xf32>
    %cst_7 = arith.constant dense<0.000000e+00> : vector<16x128xf32>
    %15 = tpu.matmul %13, %14, %cst_7 {dimension_numbers = #tpu.dot_dimension_numbers<[1], [0], [0], [1], [0, 0, 1, 1], [], []>} : vector<16x32xf32>, vector<32x128xf32>, vector<16x128xf32> -> vector<16x128xf32>
    %c0_8 = arith.constant 0 : index
    %c0_9 = arith.constant 0 : index
    %16 = vector.load %arg3[%c0_8, %c0_9] : memref<1x128xf32, #tpu.memory_space<vmem>>, vector<1x128xf32>
    %17 = vector.broadcast %16 : vector<1x128xf32> to vector<16x128xf32>
    %18 = arith.addf %15, %17 : vector<16x128xf32>
    %cst_10 = arith.constant dense<0xFF800000> : vector<16xf32>
    %19 = vector.multi_reduction <maximumf>, %18, %cst_10 [1] : vector<16x128xf32> to vector<16xf32>
    %20 = vector.shape_cast %19 : vector<16xf32> to vector<16x1xf32>
    %21 = vector.broadcast %20 : vector<16x1xf32> to vector<16x128xf32>
    %22 = arith.subf %18, %21 : vector<16x128xf32>
    %23 = math.exp %22 : vector<16x128xf32>
    %cst_11 = arith.constant dense<0.000000e+00> : vector<16xf32>
    %24 = vector.multi_reduction <add>, %23, %cst_11 [1] : vector<16x128xf32> to vector<16xf32>
    %25 = vector.shape_cast %24 : vector<16xf32> to vector<16x1xf32>
    %26 = math.log %25 : vector<16x1xf32>
    %27 = vector.broadcast %26 : vector<16x1xf32> to vector<16x128xf32>
    %28 = arith.subf %22, %27 : vector<16x128xf32>
    %c0_12 = arith.constant 0 : index
    %c0_13 = arith.constant 0 : index
    %29 = vector.load %arg4[%c0_12, %c0_13] : memref<16x128xf32, #tpu.memory_space<vmem>>, vector<16x128xf32>
    tpu.vector_store %arg4[%c0_12, %c0_13], %28 {strides = array<i32>} : memref<16x128xf32, #tpu.memory_space<vmem>>, vector<16x128xf32>,
    return
  }
}

</mosaic_0001>

<bundles_post_ra>
// kernel: projection_forward.1
= control target key start
LH: loop header
LB: loop body
LE: loop exit
PB: predicated region body
PF: predicated region fallthrough
CT: control target
= control target key end

     0   :  { %9 = vsyncpa [#allocation3], 0  ;;  %s410_s0 = inlined_call_operand.hbm [shape: f32[16,32], index: 0, kind: input, shape index: {}]   ;;  %s411_s1 = inlined_call_operand.vmem [shape: f32[1,32], index: 1, kind: input, shape index: {}]   ;;  %s412_s2 = inlined_call_operand.hbm [shape: f32[32,128], index: 2, kind: input, shape index: {}]   ;;  %s413_s3 = inlined_call_operand.vmem [shape: f32[1,128], index: 3, kind: input, shape index: {}]   ;;  %s414_s4 = inlined_call_operand.hbm [shape: f32[16,128], index: 4, kind: output, shape index: {}]  }
   0x1   :  { %10 = vsyncpa [#allocation6], 0 }
   0x2   :  { %11 = vsyncpa [#allocation4], 0  ;;  %s325_s15 = smov [#allocation2]   ;;  %s253_s19 = scalar_lea.hbm %s410_s0, 256 }
   0x3   :  { %s17_s16 = sshll.u32 %s325_s15, 4  ;;  %p254_p0 = scmp.ne.s32.totalorder %s410_s0, %s253_s19  ;;  %s18_s16 = int_to_ptr.vmem [resolvable:$true] %s17_s16 }
   0x4   :  { %p257_p1 = scmp.lt.u32.totalorder %s253_s19, %s410_s0 }
   0x6   :  { %p259_p2 = pnand %p257_p1, %p254_p0 }
   0x8   :  { %262 = shalt.err (!%p259_p2)
}
   0x9   :  { %s263_s24 = scalar_lea.vmem %s18_s16, 256  ;;  %p268_p4 = scmp.lt.s32.totalorder %s18_s16, %s18_s16 }
   0xa   :  { %p264_p3 = scmp.ne.s32.totalorder %s18_s16, %s263_s24  ;;  %p269_p5 = scmp.lt.s32.totalorder %s263_s24, %s263_s24 }
   0xc   :  { %p270_p6 = por %p269_p5, %p268_p4 }
   0xe   :  { %p271_p7 = pnand %p270_p6, %p264_p3 }
  0x10   :  { %274 = shalt.err (!%p271_p7)
}
  0x11   :  { %s326_s25 = smov 128   ;;  %s327_s26 = smov 8  }
  0x12   :  { %23 = dma.hbm_to_vmem [thread:$0]  %s410_s0, 256, %s18_s16, [#allocation3], %s326_s25, %s326_s25, %s327_s26  }
  0x13   :  { %s328_s29 = smov [#allocation5]   ;;  %s275_s7 = scalar_lea.hbm %s412_s2, 512 }
  0x14   :  { %s31_s30 = sshll.u32 %s328_s29, 4  ;;  %p276_p8 = scmp.ne.s32.totalorder %s412_s2, %s275_s7  ;;  %s32_s30 = int_to_ptr.vmem [resolvable:$true] %s31_s30 }
  0x15   :  { %p279_p9 = scmp.lt.u32.totalorder %s275_s7, %s412_s2 }
  0x17   :  { %p281_p10 = pnand %p279_p9, %p276_p8 }
  0x19   :  { %284 = shalt.err (!%p281_p10)
}
  0x1a   :  { %s285_s12 = scalar_lea.vmem %s32_s30, 512  ;;  %p290_p12 = scmp.lt.s32.totalorder %s32_s30, %s32_s30 }
  0x1b   :  { %p286_p11 = scmp.ne.s32.totalorder %s32_s30, %s285_s12  ;;  %p291_p13 = scmp.lt.s32.totalorder %s285_s12, %s285_s12 }
  0x1d   :  { %p292_p0 = por %p291_p13, %p290_p12 }
  0x1f   :  { %p293_p1 = pnand %p292_p0, %p286_p11 }
  0x21   :  { %296 = shalt.err (!%p293_p1)
}
  0x22   :  { %37 = dma.hbm_to_vmem [thread:$0]  %s412_s2, 512, %s32_s30, [#allocation6], %s326_s25, %s326_s25, %s327_s26  }
  0x23   :  { %319 = dma.done.wait [#allocation3], 256  }
  0x24   :  { %320 = vsyncadd [#allocation3], 4294967040 }
  0x25   :  { %321 = dma.done.wait [#allocation6], 512  }
  0x26   :  { %322 = vsyncadd [#allocation6], 4294966784  ;;  %v46_v0 = vld [vmem:[#allocation2] sm:$0xff]  ;;  %vm50_vm0 = vcmask 261120   ;;  %v47_v1 = vld [vmem:[#allocation2 + $0x8] sm:$0xff] }
  0x27   :  { %v48_v2 = vmul.f32 %v46_v0, %v46_v0  ;;  %v49_v3 = vmul.f32 %v47_v1, %v47_v1  ;;  %v75_v6 = vld [vmem:[#allocation5] sm:$0xff]  ;;  %v76_v7 = vld [vmem:[#allocation5 + $0x8] sm:$0xff]  ;;  %v77_v8 = vld [vmem:[#allocation5 + $0x10] sm:$0xff] }
  0x28   :  { %v228_v9 = vpack.c.bf16 %v76_v7, %v75_v6  ;;  %v78_v10 = vld [vmem:[#allocation5 + $0x18] sm:$0xff]  ;;  %v207_v19 = vld [vmem:[%s411_s1] ss:$0 sm:$0xff]  ;;  %s329_s1 = smov [#allocation7]  }
  0x29   :  { %v51_v4 = vsel %vm50_vm0, %v48_v2, 0.0  ;;  %v54_v5 = vsel %vm50_vm0, %v49_v3, 0.0  ;;  %v232_v11 = vpack.c.bf16 %v78_v10, %v77_v8  ;;  %v208_v25 = vld [vmem:[%s413_s3] ss:$0 sm:$0xff]  ;;  %s194_s3 = sshll.u32 %s329_s1, 4  ;;  %s195_s3 = int_to_ptr.vmem [resolvable:$true] %s194_s3 }
  0x2a   :  { %52 = vadd.xlane.f32.xlu0 %v51_v4  ;;  %229 = vmatprep.subr.bf16.mxu0 %v228_v9  ;;  %s297_s17 = scalar_lea.vmem %s195_s3, 256  ;;  %p302_p3 = scmp.lt.s32.totalorder %s195_s3, %s195_s3 }
  0x2b   :  { %231 = vmatpush3.bf16.msra.mxu0 %v228_v9  ;;  %p298_p2 = scmp.ne.s32.totalorder %s195_s3, %s297_s17  ;;  %p303_p4 = scmp.lt.s32.totalorder %s297_s17, %s297_s17 }
  0x2c   :  { %233 = vmatprep.subr.bf16.mxu0 %v232_v11 }
  0x2d   :  { %p304_p5 = por %p303_p4, %p302_p3 }
  0x2e   :  { %55 = vadd.xlane.f32.xlu0 %v54_v5 }
  0x2f   :  { %235 = vmatpush3.bf16.msra.mxu0 %v232_v11  ;;  %p305_p6 = pnand %p304_p5, %p298_p2 }
  0xb7   :  { %v53_v12 = vpop.xlane.xlu0 %52 }
  0xb8   :  { %v58_v13 = vmul.f32 0.03125, %v53_v12 }
  0xba   :  { %v60_v14 = vadd.f32 1e-05, %v58_v13 }
  0xbb   :  { %v56_v15 = vpop.xlane.xlu0 %55 }
  0xbc   :  { %241 = vrsqrt.f32 %v60_v14  ;;  %v59_v16 = vmul.f32 0.03125, %v56_v15 }
  0xbe   :  { %v61_v17 = vadd.f32 1e-05, %v59_v16 }
  0xc0   :  { %243 = vrsqrt.f32 %v61_v17 }
  0xc6   :  { %v242_v18 = vpop.eup %241 }
  0xc7   :  { %v64_v20 = vmul.f32 %v242_v18, %v46_v0 }
  0xc9   :  { %v73_v21 = vmul.f32 %v207_v19, %v64_v20 }
  0xca   :  { %v244_v22 = vpop.eup %243 }
  0xcb   :  { %v65_v23 = vmul.f32 %v244_v22, %v47_v1  ;;  %225 = vmatprep.mubr.msk.f32.mxu0 %vm50_vm0, %v73_v21 }
  0xcd   :  { %v74_v24 = vmul.f32 %v207_v19, %v65_v23 }
  0xcf   :  { %226 = vmatmul.mubr.msk.f32.vlgmr.msra.gmra.mrb[0].mxu0 %vm50_vm0, %v74_v24 }
 0x1a2   :  { %v227_v26 = vpop.f32.mrb[0].mxu0 }
 0x1a3   :  { %v158_v27 = vpop.f32.mrb[1].mxu0  ;;  %v164_v29 = vadd.f32 %v227_v26, %v208_v25 }
 0x1a4   :  { %v159_v28 = vadd.f32 %v208_v25, %v158_v27 }
 0x1a6   :  { %167 = vmax.xlane.f32.xlu1 %v159_v28 }
 0x1aa   :  { %169 = vmax.xlane.f32.xlu1 %v164_v29 }
 0x233   :  { %v168_v30 = vpop.xlane.xlu1 %167 }
 0x234   :  { %v171_v31 = vsub.f32 %v159_v28, %v168_v30 }
 0x236   :  { %v173_v32 = vmul.f32 1.442695, %v171_v31 }
 0x237   :  { %v170_v33 = vpop.xlane.xlu1 %169 }
 0x238   :  { %245 = vpow2.f32 %v173_v32  ;;  %v172_v34 = vsub.f32 %v164_v29, %v170_v33 }
 0x23a   :  { %v175_v35 = vmul.f32 1.442695, %v172_v34 }
 0x23c   :  { %247 = vpow2.f32 %v175_v35 }
 0x242   :  { %v246_v36 = vpop.eup %245 }
 0x243   :  { %177 = vadd.xlane.f32.xlu0 %v246_v36 }
 0x246   :  { %v248_v37 = vpop.eup %247 }
 0x247   :  { %179 = vadd.xlane.f32.xlu1 %v248_v37 }
 0x2d0   :  { %v178_v38 = vpop.xlane.xlu0 %177 }
 0x2d1   :  { %249 = vlog2.f32 %v178_v38 }
 0x2d4   :  { %v180_v39 = vpop.xlane.xlu1 %179 }
 0x2d5   :  { %251 = vlog2.f32 %v180_v39 }
 0x2db   :  { %v250_v40 = vpop.eup %249 }
 0x2dc   :  { %v182_v41 = vmul.f32 0.6931472, %v250_v40 }
 0x2de   :  { %v185_v42 = vsub.f32 %v171_v31, %v182_v41 }
 0x2df   :  { %v252_v43 = vpop.eup %251 }
 0x2e0   :  { %187 = vst [vmem:[#allocation7] sm:$0xff] %v185_v42  ;;  %v184_v44 = vmul.f32 0.6931472, %v252_v43 }
 0x2e2   :  { %v186_v45 = vsub.f32 %v172_v34, %v184_v44 }
 0x2e4   :  { %188 = vst [vmem:[#allocation7 + $0x8] sm:$0xff] %v186_v45 }
 0x2e5   :  { %308 = shalt.err (!%p305_p6)
}
 0x2e6   :  { %s309_s20 = scalar_lea.hbm %s414_s4, 256 }
 0x2e7   :  { %p310_p7 = scmp.ne.s32.totalorder %s414_s4, %s309_s20  ;;  %p313_p8 = scmp.lt.u32.totalorder %s309_s20, %s414_s4 }
 0x2e9   :  { %p315_p9 = pnand %p313_p8, %p310_p7 }
 0x2eb   :  { %318 = shalt.err (!%p315_p9)
}
 0x2ec   :  { %200 = dma.vmem_to_hbm [thread:$0]  %s195_s3, 256, %s414_s4, [#allocation4], %s326_s25, %s326_s25, %s327_s26  }
 0x2ed   :  { %323 = dma.done.wait [#allocation4], 256  }
 0x2ee   :  { %324 = vsyncadd [#allocation4], 4294967040 }
 0x2ef   :  { %204 = vsyncpa [#allocation3], 1 }
 0x2f0   :  { %205 = vsyncpa [#allocation6], 1 }
 0x2f1   :  { %206 = vsyncpa [#allocation4], 1 }

</bundles_post_ra>
